<compile_context>
chip_gen: v7x
topology: tpu7x:2x2x1
jax: 0.10.0
libtpu: 0.0.40
codegen_flags: <defaults>
</compile_context>

<pallas_src>
import functools

import jax
import jax.numpy as jnp
from jax import lax
from jax.experimental import pallas as pl
from jax.experimental.pallas import tpu as pltpu

_LANES = 128
_SUBLANES = 8


def _dice_partial_kernel(pred_ref, targ_ref, out_ref, *,
                         rows, nrow, unroll, tiles_per_split, mask_needed):
    """Accumulate per-batch [intersection, pred_sum, target_sum] partials.

    pred_ref/targ_ref: (rows, 128) blocks (batch dim squeezed).
    out_ref: (3, 8, 128) accumulator block, resident across the row-tile axis
             for the current (core-split, batch) pair.
    """
    c = pl.program_id(0)            # core-split index over the row-tile axis
    t = pl.program_id(2)            # row-tile index within this split
    tt = c * tiles_per_split + t    # global row-tile index

    @pl.when(t == 0)
    def _init():
        out_ref[...] = jnp.zeros_like(out_ref)

    chunks = rows // _SUBLANES
    steps = chunks // unroll
    zero = jnp.zeros((_SUBLANES, _LANES), jnp.float32)

    def accumulate(masked):
        def body(i, carry):
            inter_acc, p_acc, g_acc = carry
            base = pl.multiple_of(i * (_SUBLANES * unroll), _SUBLANES * unroll)
            new_i, new_p, new_g = [], [], []
            for u in range(unroll):
                r0 = pl.multiple_of(base + u * _SUBLANES, _SUBLANES)
                p = pred_ref[pl.ds(r0, _SUBLANES), :].astype(jnp.float32)
                g = targ_ref[pl.ds(r0, _SUBLANES), :].astype(jnp.float32)
                if masked:
                    # Mask BOTH operands before the multiply so OOB garbage
                    # (incl. NaN/Inf) never reaches the sums.
                    row = (tt * rows + r0
                           + lax.broadcasted_iota(jnp.int32,
                                                  (_SUBLANES, _LANES), 0))
                    valid = row < nrow
                    p = jnp.where(valid, p, 0.0)
                    g = jnp.where(valid, g, 0.0)
                # `unroll` independent accumulator chains per quantity.
                new_i.append(inter_acc[u] + p * g)
                new_p.append(p_acc[u] + p)
                new_g.append(g_acc[u] + g)
            return tuple(new_i), tuple(new_p), tuple(new_g)

        init = ((zero,) * unroll, (zero,) * unroll, (zero,) * unroll)
        inter_acc, p_acc, g_acc = lax.fori_loop(0, steps, body, init)

        def tree_sum(xs):
            xs = list(xs)
            while len(xs) > 1:
                tail = [xs[-1]] if len(xs) % 2 else []
                xs = [a + b for a, b in zip(xs[::2], xs[1::2])] + tail
            return xs[0]

        out_ref[0] += tree_sum(inter_acc)
        out_ref[1] += tree_sum(p_acc)
        out_ref[2] += tree_sum(g_acc)

    if mask_needed:
        last_partial = ((tt + 1) * rows) > nrow
        @pl.when(jnp.logical_not(last_partial))
        def _plain():
            accumulate(False)

        @pl.when(last_partial)
        def _masked():
            accumulate(True)
    else:
        accumulate(False)


def _pick_rows_per_block(nrow, itemsize):
    """VMEM-capacity-aware row-tile size (multiple of 8) + unroll factor."""
    try:
        vmem_bytes = pltpu.get_tpu_info().vmem_capacity_bytes
    except Exception:
        vmem_bytes = 64 * 1024 * 1024  # assume the smallest (v7x) if unknown
    # Streaming kernels reach ~85% of HBM roofline from ~2 MiB blocks on;
    # ~2-4 MiB blocks keep the ~0.35us/step grid overhead <5% without
    # doubling VMEM pressure (2 inputs x 2 pipeline buffers live on v7x).
    per_block_bytes = vmem_bytes // 32
    rows = per_block_bytes // (_LANES * itemsize)
    granule = _SUBLANES * 4                        # prefer unroll-by-4 tiles
    rows = max(granule, (rows // granule) * granule)
    rows_cap = -(-nrow // _SUBLANES) * _SUBLANES   # nrow rounded up to 8
    rows = min(rows, rows_cap)                     # always a multiple of 8
    chunks = rows // _SUBLANES
    unroll = 4 if chunks % 4 == 0 else (2 if chunks % 2 == 0 else 1)
    return rows, unroll, vmem_bytes


def soft_binary_dice_loss(pred, target, smooth=1e-5):
    """Pallas implementation of SoftBinaryDiceLoss.forward."""
    assert pred.shape == target.shape
    b = pred.shape[0]
    pred2 = pred.reshape(b, -1)
    targ2 = target.reshape(b, -1)
    n = pred2.shape[1]

    # Pad the flat axis only up to a multiple of 128 lanes (free when
    # d*h*w % 128 == 0, as for typical volumetric shapes and the test shape).
    # TODO(synk): lane-level tail mask (flat index < n) inside the kernel to
    # eliminate the jnp.pad HBM copy for ragged widths entirely.
    pad = (-n) % _LANES
    if pad:
        pred2 = jnp.pad(pred2, ((0, 0), (0, pad)))
        targ2 = jnp.pad(targ2, ((0, 0), (0, pad)))
    nrow = (n + pad) // _LANES
    pred3 = pred2.reshape(b, nrow, _LANES)
    targ3 = targ2.reshape(b, nrow, _LANES)

    itemsize = max(pred3.dtype.itemsize, targ3.dtype.itemsize)
    rows, unroll, vmem_bytes = _pick_rows_per_block(nrow, itemsize)
    total_tiles = pl.cdiv(nrow, rows)
    mask_needed = (total_tiles * rows) != nrow

    # Core-split fallback: when b alone can't use both v7x TensorCores
    # (b odd / b==1), also shard the row-tile axis across a leading
    # "parallel" grid axis.  No effect on single-TC v5e/v6e.
    splits = 2 if (b % 2 == 1 and total_tiles % 2 == 0 and total_tiles >= 2) else 1
    tiles_per_split = total_tiles // splits

    kernel = functools.partial(
        _dice_partial_kernel, rows=rows, nrow=nrow, unroll=unroll,
        tiles_per_split=tiles_per_split, mask_needed=mask_needed)

    in_bytes = 2 * b * nrow * _LANES * itemsize
    out_bytes = splits * b * 3 * _SUBLANES * _LANES * 4
    cost = pl.CostEstimate(flops=4 * b * nrow * _LANES,
                           transcendentals=0,
                           bytes_accessed=in_bytes + out_bytes)

    partial_sums = pl.pallas_call(
        kernel,
        out_shape=jax.ShapeDtypeStruct((splits, b, 3, _SUBLANES, _LANES),
                                       jnp.float32),
        grid_spec=pltpu.PrefetchScalarGridSpec(
            num_scalar_prefetch=0,
            grid=(splits, b, tiles_per_split),
            in_specs=[
                pl.BlockSpec((None, rows, _LANES),
                             lambda c, i, t: (i, c * tiles_per_split + t, 0)),
                pl.BlockSpec((None, rows, _LANES),
                             lambda c, i, t: (i, c * tiles_per_split + t, 0)),
            ],
            out_specs=pl.BlockSpec((None, None, 3, _SUBLANES, _LANES),
                                   lambda c, i, t: (c, i, 0, 0, 0)),
        ),
        compiler_params=pltpu.CompilerParams(
            dimension_semantics=("parallel", "parallel", "arbitrary"),
            vmem_limit_bytes=vmem_bytes // 4),
        cost_estimate=cost,
    )(pred3, targ3)

    # Tiny finalize in plain JAX: one cross-lane reduce + the dice combine.
    sums = partial_sums.sum(axis=(0, 3, 4))             # (b, 3)
    inter, psum, tsum = sums[:, 0], sums[:, 1], sums[:, 2]
    dice = (2.0 * inter + smooth) / (psum + tsum + smooth)
    return 1.0 - jnp.sum(dice) / b


def _reference(pred, target, smooth=1e-5):
    b = pred.shape[0]
    p = pred.reshape(b, -1).astype(jnp.float32)
    g = target.reshape(b, -1).astype(jnp.float32)
    inter = jnp.sum(p * g, axis=1)
    dice = (2.0 * inter + smooth) / (jnp.sum(p, axis=1) + jnp.sum(g, axis=1) + smooth)
    return 1.0 - jnp.sum(dice) / b


if __name__ == "__main__":
    key = jax.random.PRNGKey(0)
    k1, k2 = jax.random.split(key)
    b, d, h, w = 2, 4, 16, 16
    pred = jax.nn.sigmoid(jax.random.normal(k1, (b, d, h, w), dtype=jnp.float32))
    target = (jax.random.uniform(k2, (b, d, h, w)) > 0.5).astype(jnp.float32)

    loss = soft_binary_dice_loss(pred, target)
    jax.block_until_ready(loss)

    ref = _reference(pred, target)
    assert jnp.allclose(loss, ref, atol=1e-5, rtol=1e-5), (loss, ref)
    print("KERNEL_OK")
</pallas_src>

<mosaic_0001>
module attributes {stable_mosaic.version = 11 : i64} {
  func.func @_dice_partial_kernel(%arg0: i32, %arg1: i32, %arg2: i32, %arg3: memref<1x8x128xf32, #tpu.memory_space<vmem>>, %arg4: memref<1x8x128xf32, #tpu.memory_space<vmem>>, %arg5: memref<1x1x3x8x128xf32, #tpu.memory_space<vmem>>) attributes {dimension_semantics = [#tpu.dimension_semantics<parallel>, #tpu.dimension_semantics<parallel>, #tpu.dimension_semantics<arbitrary>], iteration_bounds = array<i64: 1, 2, 1>, scalar_prefetch = 0 : i64, scratch_operands = 0 : i64, tpu.core_type = #tpu.core_type<tc>, window_params = [{transform_indices = @transform_0, window_bounds = array<i64: 1, 8, 128>}, {transform_indices = @transform_1, window_bounds = array<i64: 1, 8, 128>}, {transform_indices = @transform_2, window_bounds = array<i64: 1, 1, 3, 8, 128>}]} {
    %c0_i32 = arith.constant 0 : i32
    %0 = arith.cmpi eq, %arg2, %c0_i32 : i32
    %1 = arith.extui %0 : i1 to i32
    %c0_i32_0 = arith.constant 0 : i32
    %2 = arith.cmpi ne, %1, %c0_i32_0 : i32
    scf.if %2 {
      %cst_34 = arith.constant 0.000000e+00 : f32
      %36 = vector.broadcast %cst_34 : f32 to vector<3x8x128xf32>
      %c0_35 = arith.constant 0 : index
      %c0_36 = arith.constant 0 : index
      %c0_37 = arith.constant 0 : index
      %c0_38 = arith.constant 0 : index
      %c0_39 = arith.constant 0 : index
      %37 = vector.load %arg5[%c0_35, %c0_36, %c0_37, %c0_38, %c0_39] : memref<1x1x3x8x128xf32, #tpu.memory_space<vmem>>, vector<1x1x3x8x128xf32>
      %38 = vector.shape_cast %37 : vector<1x1x3x8x128xf32> to vector<3x8x128xf32>
      %39 = vector.shape_cast %36 : vector<3x8x128xf32> to vector<1x1x3x8x128xf32>
      tpu.vector_store %arg5[%c0_35, %c0_36, %c0_37, %c0_38, %c0_39], %39 {strides = array<i32>} : memref<1x1x3x8x128xf32, #tpu.memory_space<vmem>>, vector<1x1x3x8x128xf32>,
    } else {
    }
    %cst = arith.constant 0.000000e+00 : f32
    %3 = vector.broadcast %cst : f32 to vector<8x128xf32>
    %c0_i32_1 = arith.constant 0 : i32
    %c8_i32 = arith.constant 8 : i32
    %4 = arith.muli %c0_i32_1, %c8_i32 : i32
    %5 = tpu.assume_multiple %4, 8 : i32
    %c0_i32_2 = arith.constant 0 : i32
    %6 = arith.addi %5, %c0_i32_2 : i32
    %7 = tpu.assume_multiple %6, 8 : i32
    %c0 = arith.constant 0 : index
    %8 = arith.index_cast %7 : i32 to index
    %c0_3 = arith.constant 0 : index
    %9 = vector.load %arg3[%c0, %8, %c0_3] : memref<1x8x128xf32, #tpu.memory_space<vmem>>, vector<1x8x128xf32>
    %10 = vector.shape_cast %9 : vector<1x8x128xf32> to vector<8x128xf32>
    %c0_4 = arith.constant 0 : index
    %11 = arith.index_cast %7 : i32 to index
    %c0_5 = arith.constant 0 : index
    %12 = vector.load %arg4[%c0_4, %11, %c0_5] : memref<1x8x128xf32, #tpu.memory_space<vmem>>, vector<1x8x128xf32>
    %13 = vector.shape_cast %12 : vector<1x8x128xf32> to vector<8x128xf32>
    %14 = arith.mulf %10, %13 : vector<8x128xf32>
    %15 = arith.addf %3, %14 : vector<8x128xf32>
    %16 = arith.addf %3, %10 : vector<8x128xf32>
    %17 = arith.addf %3, %13 : vector<8x128xf32>
    %c1_i32 = arith.constant 1 : i32
    %c0_6 = arith.constant 0 : index
    %c0_7 = arith.constant 0 : index
    %c0_8 = arith.constant 0 : index
    %c0_9 = arith.constant 0 : index
    %c0_10 = arith.constant 0 : index
    %18 = vector.load %arg5[%c0_6, %c0_7, %c0_8, %c0_9, %c0_10] : memref<1x1x3x8x128xf32, #tpu.memory_space<vmem>>, vector<1x1x1x8x128xf32>
    %19 = vector.shape_cast %18 : vector<1x1x1x8x128xf32> to vector<8x128xf32>
    %20 = arith.addf %19, %15 : vector<8x128xf32>
    %c0_11 = arith.constant 0 : index
    %c0_12 = arith.constant 0 : index
    %c0_13 = arith.constant 0 : index
    %c0_14 = arith.constant 0 : index
    %c0_15 = arith.constant 0 : index
    %21 = vector.load %arg5[%c0_11, %c0_12, %c0_13, %c0_14, %c0_15] : memref<1x1x3x8x128xf32, #tpu.memory_space<vmem>>, vector<1x1x1x8x128xf32>
    %22 = vector.shape_cast %21 : vector<1x1x1x8x128xf32> to vector<8x128xf32>
    %23 = vector.shape_cast %20 : vector<8x128xf32> to vector<1x1x1x8x128xf32>
    tpu.vector_store %arg5[%c0_11, %c0_12, %c0_13, %c0_14, %c0_15], %23 {strides = array<i32>} : memref<1x1x3x8x128xf32, #tpu.memory_space<vmem>>, vector<1x1x1x8x128xf32>,
    %c0_16 = arith.constant 0 : index
    %c0_17 = arith.constant 0 : index
    %c1 = arith.constant 1 : index
    %c0_18 = arith.constant 0 : index
    %c0_19 = arith.constant 0 : index
    %24 = vector.load %arg5[%c0_16, %c0_17, %c1, %c0_18, %c0_19] : memref<1x1x3x8x128xf32, #tpu.memory_space<vmem>>, vector<1x1x1x8x128xf32>
    %25 = vector.shape_cast %24 : vector<1x1x1x8x128xf32> to vector<8x128xf32>
    %26 = arith.addf %25, %16 : vector<8x128xf32>
    %c0_20 = arith.constant 0 : index
    %c0_21 = arith.constant 0 : index
    %c1_22 = arith.constant 1 : index
    %c0_23 = arith.constant 0 : index
    %c0_24 = arith.constant 0 : index
    %27 = vector.load %arg5[%c0_20, %c0_21, %c1_22, %c0_23, %c0_24] : memref<1x1x3x8x128xf32, #tpu.memory_space<vmem>>, vector<1x1x1x8x128xf32>
    %28 = vector.shape_cast %27 : vector<1x1x1x8x128xf32> to vector<8x128xf32>
    %29 = vector.shape_cast %26 : vector<8x128xf32> to vector<1x1x1x8x128xf32>
    tpu.vector_store %arg5[%c0_20, %c0_21, %c1_22, %c0_23, %c0_24], %29 {strides = array<i32>} : memref<1x1x3x8x128xf32, #tpu.memory_space<vmem>>, vector<1x1x1x8x128xf32>,
    %c0_25 = arith.constant 0 : index
    %c0_26 = arith.constant 0 : index
    %c2 = arith.constant 2 : index
    %c0_27 = arith.constant 0 : index
    %c0_28 = arith.constant 0 : index
    %30 = vector.load %arg5[%c0_25, %c0_26, %c2, %c0_27, %c0_28] : memref<1x1x3x8x128xf32, #tpu.memory_space<vmem>>, vector<1x1x1x8x128xf32>
    %31 = vector.shape_cast %30 : vector<1x1x1x8x128xf32> to vector<8x128xf32>
    %32 = arith.addf %31, %17 : vector<8x128xf32>
    %c0_29 = arith.constant 0 : index
    %c0_30 = arith.constant 0 : index
    %c2_31 = arith.constant 2 : index
    %c0_32 = arith.constant 0 : index
    %c0_33 = arith.constant 0 : index
    %33 = vector.load %arg5[%c0_29, %c0_30, %c2_31, %c0_32, %c0_33] : memref<1x1x3x8x128xf32, #tpu.memory_space<vmem>>, vector<1x1x1x8x128xf32>
    %34 = vector.shape_cast %33 : vector<1x1x1x8x128xf32> to vector<8x128xf32>
    %35 = vector.shape_cast %32 : vector<8x128xf32> to vector<1x1x1x8x128xf32>
    tpu.vector_store %arg5[%c0_29, %c0_30, %c2_31, %c0_32, %c0_33], %35 {strides = array<i32>} : memref<1x1x3x8x128xf32, #tpu.memory_space<vmem>>, vector<1x1x1x8x128xf32>,
    return
  }
  func.func @transform_0(%arg0: i32, %arg1: i32, %arg2: i32) -> (i32, i32, i32) {
    %c1_i32 = arith.constant 1 : i32
    %0 = arith.muli %arg0, %c1_i32 : i32
    %1 = arith.addi %0, %arg2 : i32
    %c0_i32 = arith.constant 0 : i32
    %c0_i32_0 = arith.constant 0 : i32
    return %arg1, %1, %c0_i32 : i32, i32, i32
  }
  func.func @transform_1(%arg0: i32, %arg1: i32, %arg2: i32) -> (i32, i32, i32) {
    %c1_i32 = arith.constant 1 : i32
    %0 = arith.muli %arg0, %c1_i32 : i32
    %1 = arith.addi %0, %arg2 : i32
    %c0_i32 = arith.constant 0 : i32
    %c0_i32_0 = arith.constant 0 : i32
    return %arg1, %1, %c0_i32 : i32, i32, i32
  }
  func.func @transform_2(%arg0: i32, %arg1: i32, %arg2: i32) -> (i32, i32, i32, i32, i32) {
    %c0_i32 = arith.constant 0 : i32
    %c0_i32_0 = arith.constant 0 : i32
    %c0_i32_1 = arith.constant 0 : i32
    %c0_i32_2 = arith.constant 0 : i32
    return %arg0, %arg1, %c0_i32, %c0_i32_0, %c0_i32_1 : i32, i32, i32, i32, i32
  }
}

</mosaic_0001>

<bundles_post_ra>
// kernel: tpu_custom_call.1
= control target key start
LH: loop header
LB: loop body
LE: loop exit
PB: predicated region body
PF: predicated region fallthrough
CT: control target
= control target key end

     0   :  { %7 = vsyncpa [#allocation3], 0  ;;  %s866_s0 = inlined_call_operand.hbm [shape: f32[2,8,128], index: 0, kind: input, shape index: {}]   ;;  %s867_s1 = inlined_call_operand.hbm [shape: f32[2,8,128], index: 1, kind: input, shape index: {}]   ;;  %s868_s2 = inlined_call_operand.hbm [shape: f32[1,2,3,8,128], index: 2, kind: output, shape index: {}]  }
   0x1   :  { %9 = vsyncpa [#allocation3 + $0x1], 0 }
   0x2   :  { %10 = vsyncpa [#allocation6], 0 }
   0x3   :  { %12 = vsyncpa [#allocation6 + $0x1], 0 }
   0x4   :  { %13 = vsyncpa [#allocation4], 0 }
   0x5   :  { %15 = vsyncpa [#allocation4 + $0x1], 0  ;;  %s643_s9 = smov 0   ;;  %s645_s10 = smov 0  }
   0x6   :  { %s647_s11 = smov 0   ;;  %s649_s12 = smov 0  }
   0x7   :  { %s651_s13 = smov 0   ;;  %s653_s14 = smov 0  }
   0x8 LB: > { %s385_s15 = sadd.s32 4294967295, %s621_s14   ;;  %s386_s16 = sadd.s32 4294967294, %s621_s14   ;;  %s621_s14 = sphi %s653_s14, %s21_s14   ;;  %s617_s13 = sphi %s651_s13, %s888_s13   ;;  %s613_s12 = sphi %s649_s12, %s887_s12   ;;  %s609_s11 = sphi %s647_s11, %s886_s11   ;;  %s605_s10 = sphi %s645_s10, %s885_s10   ;;  %s601_s9 = sphi %s643_s9, %s884_s9  }
   0x9   : > { %s36_s17 = sadd.s32 1, %s617_s13  ;;  %s51_s18 = sadd.s32 1, %s609_s11 }
   0xa   : > { %p38_p0 = scmp.ge.s32.totalorder %s36_s17, 2  ;;  %p58_p1 = scmp.ne.s32.totalorder %s609_s11, %s605_s10 }
   0xb   : > { %p59_p2 = scmp.eq.s32.totalorder %s621_s14, 0  ;;  %p64_p3 = scmp.ne.s32.totalorder %s605_s10, %s601_s9 }
   0xc   : > { %s890_s17 = smov (%p38_p0, %s36_s17), 0  ;;  %p65_p5 = scmp.eq.s32.totalorder %s385_s15, 0 }
   0xd   : > { %p684_p4 = por %p59_p2, %p58_p1  ;;  %s46_s20 = ssub.s32 %s617_s13, %s890_s17 }
   0xe   : > { %p120_p6 = scmp.eq.s32.totalorder %s385_s15, 1  ;;  %p49_p7 = scmp.eq.s32.totalorder %s46_s20, 0 }
   0xf   : > { %p690_p8 = por %p65_p5, %p64_p3  ;;  %p126_p10 = scmp.eq.s32.totalorder %s386_s16, 1 }
  0x10   : > { %p694_p9 = por %p120_p6, %p58_p1  ;;  %p422_p13 = scmp.lt.s32.totalorder %s621_s14, 2 }
  0x11   : > { %s872_s21 = scalar_select %p690_p8, 1, 0 }
  0x12   : > { %s873_s22 = scalar_select %p694_p9, 1, 0 }
  0x13   : > { %s699_s23 = scalar_select %p49_p7, %s609_s11, %s51_s18  }
  0x14   : > { %p701_p11 = por %p126_p10, %p64_p3  ;;  %s708_s25 = sand.u32 1, %s609_s11  }
  0x15   : > { %s389_s26 = sshll.u32 %s708_s25, 3  ;;  %s390_s27 = sshll.u32 %s617_s13, 7 }
  0x16   : > { %s874_s24 = scalar_select %p701_p11, 1, 0 }
  0x17   : > { %s717_s30 = scalar_lea.hbm %s866_s0, %s390_s27  ;;  %s150_s3 = scalar_lea.vmem [#allocation2], %s389_s26 }
  0x18   : > { %s159_s4 = sshll.u32 %s150_s3, 4  ;;  %p725_p0 = pnand %p422_p13, %p684_p4  ;;  %s721_s4 = int_to_ptr.vmem [resolvable:$true] %s159_s4 }
  0x19   : > { %s147_s6 = scalar_lea.sflag [#allocation3], %s708_s25  ;;  %s475_s7 = scalar_lea.hbm %s717_s30, 128 }
  0x1a   : > { %p476_p3 = scmp.ne.s32.totalorder %s717_s30, %s475_s7  ;;  %p477_p5 = pneg %p725_p0 }
  0x1b   : > { %s480_s16 = scalar_lea.hbm %s866_s0, 256  ;;  %p481_p4 = scmp.lt.u32.totalorder %s717_s30, %s866_s0 }
  0x1c   : > { %p478_p6 = pnand %p477_p5, %p476_p3  ;;  %p482_p10 = scmp.lt.u32.totalorder %s480_s16, %s475_s7 }
  0x1d   : > { %p484_p12 = scmp.lt.u32.totalorder %s475_s7, %s717_s30 }
  0x1e   : > { %p479_p7 = pneg %p478_p6  ;;  %p483_p13 = por %p482_p10, %p481_p4 }
  0x20   : > { %p485_p1 = por %p484_p12, %p483_p13 }
  0x22   : > { %p486_p2 = pnand %p485_p1, %p479_p7 }
  0x24   : > { %489 = shalt.err (!%p486_p2)
}
  0x25   : > { %s490_s20 = scalar_lea.vmem %s721_s4, 128  ;;  %s623_s28 = smov [#allocation2]  }
  0x26   : > { %p491_p3 = scmp.ne.s32.totalorder %s721_s4, %s490_s20  ;;  %s495_s29 = sshll.u32 %s623_s28, 4  ;;  %s496_s29 = int_to_ptr.vmem [resolvable:$false] %s495_s29 }
  0x27   : > { %s497_s3 = scalar_lea.vmem %s496_s29, 256  ;;  %p498_p9 = scmp.lt.s32.totalorder %s721_s4, %s496_s29 }
  0x28   : > { %p493_p6 = pnand %p491_p3, %p477_p5  ;;  %p499_p4 = scmp.lt.s32.totalorder %s497_s3, %s490_s20 }
  0x2a   : > { %p494_p11 = pneg %p493_p6  ;;  %p500_p10 = por %p499_p4, %p498_p9 }
  0x2c   : > { %p501_p12 = pnand %p500_p10, %p494_p11 }
  0x2e   : > { %504 = shalt.err (!%p501_p12)
}
  0x2f   : > { %414 = dma.hbm_to_vmem [thread:$0]  (!%p725_p0), %s717_s30, 128, %s721_s4, %s147_s6  }
  0x30   : > { %p876_p1 = scmp.lt.s32.totalorder %s621_s14, 3  ;;  %p877_p2 = scmp.ge.s32.totalorder %s621_s14, 1 }
  0x31   : > { %s770_s16 = scalar_lea.hbm %s867_s1, %s390_s27  ;;  %s170_s18 = scalar_lea.vmem [#allocation5], %s389_s26 }
  0x32   : > { %p761_p7 = pnand %p877_p2, %p876_p1  ;;  %s179_s19 = sshll.u32 %s170_s18, 4  ;;  %s180_s19 = int_to_ptr.vmem [resolvable:$true] %s179_s19 }
  0x33   : > { %s167_s30 = scalar_lea.sflag [#allocation6], %s708_s25  ;;  %s505_s4 = scalar_lea.hbm %s770_s16, 128 }
  0x34   : > { %s878_s7 = scalar_select %p761_p7, 1, 0 }
  0x35   : > { %p506_p9 = scmp.ne.s32.totalorder %s770_s16, %s505_s4  ;;  %s510_s27 = scalar_lea.hbm %s867_s1, 256 }
  0x36   : > { %p511_p3 = scmp.lt.u32.totalorder %s770_s16, %s867_s1  ;;  %p512_p6 = scmp.lt.u32.totalorder %s510_s27, %s505_s4 }
  0x37   : > { %p508_p11 = pnand %p506_p9, %p477_p5  ;;  %p514_p10 = scmp.lt.u32.totalorder %s505_s4, %s770_s16 }
  0x38   : > { %p513_p4 = por %p512_p6, %p511_p3 }
  0x39   : > { %p509_p13 = pneg %p508_p11 }
  0x3a   : > { %p515_p12 = por %p514_p10, %p513_p4 }
  0x3c   : > { %p516_p1 = pnand %p515_p12, %p509_p13 }
  0x3e   : > { %519 = shalt.err (!%p516_p1)
}
  0x3f   : > { %s520_s25 = scalar_lea.vmem %s180_s19, 128  ;;  %s624_s26 = smov [#allocation5]  }
  0x40   : > { %p521_p2 = scmp.ne.s32.totalorder %s180_s19, %s520_s25  ;;  %s525_s3 = sshll.u32 %s624_s26, 4  ;;  %s526_s3 = int_to_ptr.vmem [resolvable:$false] %s525_s3 }
  0x41   : > { %s527_s8 = scalar_lea.vmem %s526_s3, 256  ;;  %p528_p8 = scmp.lt.s32.totalorder %s180_s19, %s526_s3 }
  0x42   : > { %p523_p9 = pnand %p521_p2, %p477_p5  ;;  %p529_p7 = scmp.lt.s32.totalorder %s527_s8, %s520_s25 }
  0x44   : > { %p524_p11 = pneg %p523_p9  ;;  %p530_p3 = por %p529_p7, %p528_p8 }
  0x46   : > { %p531_p6 = pnand %p530_p3, %p524_p11 }
  0x48   : > { %534 = shalt.err (!%p531_p6)
}
  0x49   : > { %417 = dma.hbm_to_vmem [thread:$0]  (!%p725_p0), %s770_s16, 128, %s180_s19, %s167_s30  }
  0x4a   : > { %p879_p13 = scmp.ne.s32.totalorder %s878_s7, 0 }
  0x4b   : > { %s797_s15 = sand.u32 (!%p879_p13), 1, %s605_s10   ;;  %p880_p5 = scmp.ne.s32.totalorder (!%p879_p13), %s872_s21, 0 }
  0x4c   : > { %188 = sbr.rel (%p879_p13) target bundleno = 113 (0x71), region = 28  ;;  %s394_s18 = sshll.u32 (!%p879_p13), %s797_s15, 3 }
  0x4d   : > { %s191_s4 = scalar_lea.sflag (!%p879_p13), [#allocation3], %s797_s15  ;;  %s194_s6 = scalar_lea.vmem (!%p879_p13), [#allocation2], %s394_s18 }
  0x53   : > { %588 = dma.done.wait (%p880_p5), %s191_s4, 128  }
  0x54   : > { %590 = vsyncadd (%p880_p5), %s191_s4, 4294967168  ;;  %s200_s5 = scalar_lea.sflag [#allocation6], %s797_s15  ;;  %s203_s16 = scalar_lea.vmem [#allocation5], %s394_s18 }
  0x55   : > { %592 = dma.done.wait (%p880_p5), %s200_s5, 128  }
  0x56   : > { %594 = vsyncadd (%p880_p5), %s200_s5, 4294967168  ;;  %s403_s7 = smul.u32 24, %s797_s15  ;;  %v238_v0 = vld [vmem:[%s194_s6] sm:$0xff]  ;;  %v239_v1 = vld [vmem:[%s203_s16] sm:$0xff]  ;;  %s256_s21 = scalar_lea.sflag [#allocation4], %s797_s15 }
  0x57   : > { %s404_s19 = smul.u32 384, %s613_s12  ;;  %v240_v2 = vmul.f32 %v239_v1, %v238_v0  ;;  %p881_p0 = scmp.ne.s32.totalorder %s873_s22, 0 }
  0x58   : > { %s228_s30 = scalar_lea.vmem [#allocation7], %s403_s7  ;;  %s625_s25 = smov [#allocation7]  }
  0x59   : > { %s271_s20 = sshll.u32 %s228_s30, 4  ;;  %397 = vst [vmem:[%s228_s30 + $0x8] sm:$0xff] %v238_v0  ;;  %399 = vst [vmem:[%s228_s30 + $0x10] sm:$0xff] %v239_v1  ;;  %s815_s29 = scalar_lea.hbm %s868_s2, %s404_s19  ;;  %s817_s20 = int_to_ptr.vmem [resolvable:$true] %s271_s20 }
  0x5a   : > { %246 = vst [vmem:[%s228_s30] sm:$0xff] %v240_v2  ;;  %s535_s12 = scalar_lea.vmem %s817_s20, 384  ;;  %s539_s26 = sshll.u32 %s625_s25, 4  ;;  %s540_s26 = int_to_ptr.vmem [resolvable:$false] %s539_s26 }
  0x5b   : > { %p536_p8 = scmp.ne.s32.totalorder %s817_s20, %s535_s12  ;;  %s541_s3 = scalar_lea.vmem %s540_s26, 768 }
  0x5c   : > { %p542_p10 = scmp.lt.s32.totalorder %s817_s20, %s540_s26  ;;  %p543_p12 = scmp.lt.s32.totalorder %s541_s3, %s535_s12 }
  0x5d   : > { %p537_p7 = pnand %p536_p8, %p881_p0 }
  0x5e   : > { %p544_p1 = por %p543_p12, %p542_p10 }
  0x5f   : > { %p538_p4 = pneg %p537_p7 }
  0x61   : > { %p545_p2 = pnand %p544_p1, %p538_p4 }
  0x63   : > { %548 = shalt.err (!%p545_p2)
}
  0x64   : > { %s549_s8 = scalar_lea.hbm %s815_s29, 384  ;;  %s553_s6 = scalar_lea.hbm %s868_s2, 768 }
  0x65   : > { %p550_p9 = scmp.ne.s32.totalorder %s815_s29, %s549_s8  ;;  %p554_p6 = scmp.lt.u32.totalorder %s815_s29, %s868_s2 }
  0x66   : > { %p555_p13 = scmp.lt.u32.totalorder %s553_s6, %s549_s8  ;;  %p557_p8 = scmp.lt.u32.totalorder %s549_s8, %s815_s29 }
  0x67   : > { %p551_p11 = pnand %p550_p9, %p881_p0 }
  0x68   : > { %p556_p5 = por %p555_p13, %p554_p6 }
  0x69   : > { %p552_p3 = pneg %p551_p11 }
  0x6a   : > { %p558_p7 = por %p557_p8, %p556_p5 }
  0x6c   : > { %p559_p4 = pnand %p558_p7, %p552_p3 }
  0x6e   : > { %562 = shalt.err (!%p559_p4)
}
  0x6f   : > { %s626_s7 = smov 128   ;;  %s627_s19 = smov 8  }
  0x70   : > { %409 = dma.vmem_to_hbm [thread:$0]  (%p881_p0), %s817_s20, 384, %s815_s29, %s256_s21, %s626_s7, %s626_s7, %s627_s19  }
  0x71 PF: > { %s286_s30 = sand.u32 1, %s601_s9   ;;  %p882_p10 = scmp.ne.s32.totalorder %s874_s24, 0 }
  0x72   : > { %p883_p12 = scmp.ge.s32.totalorder %s621_s14, 2  ;;  %s287_s27 = scalar_lea.sflag [#allocation4], %s286_s30 }
  0x74   : > { %p419_p1 = pnand %p883_p12, %p882_p10 }
  0x76   : > { %596 = dma.done.wait (!%p419_p1), %s287_s27, 384  }
  0x77   : > { %598 = vsyncadd (!%p419_p1), %s287_s27, 4294966912  ;;  %s21_s14 = sadd.s32 1, %s621_s14   ;;  %s884_s9 = smov %s605_s10 }
  0x78   : > { %p18_p2 = scmp.ge.s32.totalorder %s21_s14, 4   ;;  %s885_s10 = smov %s609_s11 }
  0x79   : > { %s886_s11 = smov %s699_s23  ;;  %s887_s12 = smov %s617_s13 }
  0x7a   : > { %s888_s13 = smov %s890_s17  ;;  %20 = sbr.rel (!%p18_p2) target bundleno = 8 (0x8), region = 92 }
  0x81   :  { %292 = vsyncpa [#allocation3], 1 }
  0x82   :  { %294 = vsyncpa [#allocation3 + $0x1], 1 }
  0x83   :  { %295 = vsyncpa [#allocation6], 1 }
  0x84   :  { %297 = vsyncpa [#allocation6 + $0x1], 1 }
  0x85   :  { %298 = vsyncpa [#allocation4], 1 }
  0x86   :  { %300 = vsyncpa [#allocation4 + $0x1], 1 }

</bundles_post_ra>
